<compile_context>
chip_gen: v5e
topology: v5e:2x2
jax: 0.10.0
libtpu: 0.0.40
codegen_flags: <defaults>
</compile_context>

<pallas_src>
import functools

import jax
import jax.numpy as jnp
from jax.experimental import pallas as pl
from jax.experimental.pallas import tpu as pltpu


def _round_up(v, m):
    return (v + m - 1) // m * m


def _graphs_per_block(batch, num_nodes, hidden, in_itemsize,
                      vmem_block_budget=4 << 20, target_rows=1024):
    """Graphs per grid step.

    Sized so (a) the flattened (bb*N, H) projection has ~target_rows MXU rows
    (amortizes the ~0.35us fixed per-step overhead), (b) the double-buffered
    x/adj/pooled blocks stay under vmem_block_budget (safe for v5e's 16 MiB
    scoped default and v7x's 64 MiB physical VMEM), (c) bb is a multiple of 8
    so the (bb, 128) pooled output block stays (8,128)-aligned, (d) tiny
    batches are not over-padded, and (e) batches with more than 8 graphs get
    >=2 grid steps so dimension_semantics=('parallel',) can use both v7x TCs.
    """
    per_graph = 2 * (num_nodes * hidden * in_itemsize   # x block (double-buf)
                     + num_nodes * num_nodes * 4        # adj block (f32)
                     + 128 * 4)                         # pooled out (f32)
    bb = min(vmem_block_budget // per_graph, max(1, target_rows // num_nodes))
    bb = max(8, bb // 8 * 8)
    batch8 = _round_up(batch, 8)
    bb = min(bb, batch8)
    if batch8 > 8 and bb >= batch8:       # prefer >=2 grid steps (v7x: 2 TCs)
        bb = max(8, _round_up((batch8 + 1) // 2, 8))
    return bb


def _graphsage_maxpool_kernel(x_ref, adj_ref, w_ref, b_ref, pooled_ref):
    """One grid step = bb graphs.

    x_ref   : (bb*N, H)   node embeddings, flattened (compute dtype, H native)
    adj_ref : (bb, N, N)  row-normalized adjacency (adj / max(deg, 1)), f32
    w_ref   : (H, 2*Hp)   fused [Ws | Wn] projection (output lanes zero-padded)
    b_ref   : (1, Hp)     GraphSAGE bias (f32, zero-padded)
    pooled  : (bb, Hp)    ReLU'd node features max-pooled over nodes (f32)
    """
    bb, n, _ = adj_ref.shape
    hp = pooled_ref.shape[-1]

    # One fused (bb*N, H) @ (H, 2*Hp) MXU matmul: columns [0:Hp] are the
    # self-projection, [Hp:2*Hp] the neighbor projection.  f32 accumulation.
    proj = jnp.dot(x_ref[...], w_ref[...],
                   preferred_element_type=jnp.float32)        # (bb*N, 2*Hp)
    self_p = proj[:, :hp] + b_ref[...]                        # bias added once
    neigh_p = proj[:, hp:]

    # Mean-neighbor aggregation (adjacency pre-normalized in the wrapper) on
    # the already-projected f32 features: batched tiny (N,N)@(N,Hp) matmuls,
    # no downcast of the aggregate on the bf16 path.
    nb = jnp.einsum("gnm,gmh->gnh", adj_ref[...],
                    neigh_p.reshape(bb, n, hp),
                    preferred_element_type=jnp.float32)       # (bb, N, Hp)

    h = jnp.maximum(self_p.reshape(bb, n, hp) + nb, 0.0)      # ReLU (f32)
    pooled_ref[...] = jnp.max(h, axis=1)                      # graph max-pool


def text_classifier_forward(x, adj, params, tgt=None, require_loss=True,
                            compute_dtype=jnp.bfloat16):
    """x: (B, N, H) f32 node embeddings, adj: (B, N, N) f32 adjacency."""
    B, N, H = x.shape
    Hp = _round_up(H, 128)                       # lane-dense output width
    in_itemsize = jnp.dtype(compute_dtype).itemsize
    bb = _graphs_per_block(B, N, H, in_itemsize)
    B_pad = _round_up(B, bb)
    num_blocks = B_pad // bb

    # Pre-normalize adjacency once in XLA; keep it f32 (small operand, carries
    # 1/deg fractions).
    deg = jnp.sum(adj, axis=-1, keepdims=True)
    adj_norm = (adj / jnp.maximum(deg, 1.0)).astype(jnp.float32)
    adj_p = jnp.zeros((B_pad, N, N), jnp.float32).at[:B].set(adj_norm)

    # x stays at its native H lanes in HBM (no 4x lane-pad materialization)
    # and is pre-flattened so the kernel sees a plain 2-D row block.
    x_flat = jnp.zeros((B_pad * N, H), compute_dtype)
    x_flat = x_flat.at[:B * N].set(x.reshape(B * N, H).astype(compute_dtype))

    # Fused [Ws | Wn] projection weight; each half's output lanes are
    # zero-padded to Hp so padded pooled lanes stay exactly zero.
    w_fused = jnp.zeros((H, 2 * Hp), compute_dtype)
    w_fused = w_fused.at[:, :H].set(params["w_self"].astype(compute_dtype))
    w_fused = w_fused.at[:, Hp:Hp + H].set(
        params["w_neigh"].astype(compute_dtype))
    b_gnn = jnp.zeros((1, Hp), jnp.float32).at[:, :H].set(
        params["b_gnn"].astype(jnp.float32).reshape(1, H))

    pooled = pl.pallas_call(
        _graphsage_maxpool_kernel,
        out_shape=jax.ShapeDtypeStruct((B_pad, Hp), jnp.float32),
        grid_spec=pltpu.PrefetchScalarGridSpec(
            num_scalar_prefetch=0,
            grid=(num_blocks,),
            in_specs=[
                pl.BlockSpec((bb * N, H), lambda g: (g, 0)),    # x (flattened)
                pl.BlockSpec((bb, N, N), lambda g: (g, 0, 0)),  # adj_norm f32
                pl.BlockSpec((H, 2 * Hp), lambda g: (0, 0)),    # [Ws | Wn]
                pl.BlockSpec((1, Hp), lambda g: (0, 0)),        # bias
            ],
            out_specs=pl.BlockSpec((bb, Hp), lambda g: (g, 0)),  # pooled
        ),
        compiler_params=pltpu.CompilerParams(
            dimension_semantics=("parallel",),
            vmem_limit_bytes=32 * 1024 * 1024),
    )(x_flat, adj_p, w_fused, b_gnn)

    # FeedForwardNNLayer(H, 1, [H], ReLU) head + sigmoid/BCE in XLA: it is one
    # well-shaped (B,H) matmul pair, and keeping it out of the kernel keeps
    # the kernel output lane-dense.
    pooled = pooled[:B, :H]
    hid = jax.nn.relu(pooled @ params["w1"] + params["b1"])
    logits = (hid @ params["w2"] + params["b2"]).squeeze(axis=-1)
    logits = logits.astype(jnp.float32)

    if require_loss:
        # nn.BCELoss()(sigmoid(logits), tgt) in the numerically stable
        # BCEWithLogits form.
        loss = jnp.mean(tgt * jax.nn.softplus(-logits)
                        + (1.0 - tgt) * jax.nn.softplus(logits))
        return logits, loss
    return logits


def _reference_forward(x, adj, params, tgt):
    """Pure-JAX reference implementing the original module math."""
    deg = jnp.sum(adj, axis=-1, keepdims=True)
    nb = jnp.einsum("bnm,bmh->bnh", adj, x) / jnp.maximum(deg, 1.0)
    h = jax.nn.relu(x @ params["w_self"] + nb @ params["w_neigh"]
                    + params["b_gnn"])
    pooled = jnp.max(h, axis=1)                                   # (B, H)
    hid = jax.nn.relu(pooled @ params["w1"] + params["b1"])
    logits = (hid @ params["w2"] + params["b2"]).squeeze(axis=-1)
    loss = jnp.mean(tgt * jax.nn.softplus(-logits)
                    + (1.0 - tgt) * jax.nn.softplus(logits))
    return logits.astype(jnp.float32), loss


def _init_params(key, H):
    ks = jax.random.split(key, 7)
    s = 1.0 / jnp.sqrt(H)
    return {
        "w_self":  jax.random.uniform(ks[0], (H, H), jnp.float32, -s, s),
        "w_neigh": jax.random.uniform(ks[1], (H, H), jnp.float32, -s, s),
        "b_gnn":   jax.random.uniform(ks[2], (1, H), jnp.float32, -s, s),
        "w1":      jax.random.uniform(ks[3], (H, H), jnp.float32, -s, s),
        "b1":      jax.random.uniform(ks[4], (1, H), jnp.float32, -s, s),
        "w2":      jax.random.uniform(ks[5], (H, 1), jnp.float32, -s, s),
        "b2":      jax.random.uniform(ks[6], (1, 1), jnp.float32, -s, s),
    }


if __name__ == "__main__":
    B, N, H = 2, 8, 32     # batch of graphs, nodes per graph, num_hidden
    key = jax.random.PRNGKey(0)
    kx, ka, kp, kt = jax.random.split(key, 4)

    x = jax.random.normal(kx, (B, N, H), jnp.float32)
    # symmetric binary adjacency with self-loops
    a = (jax.random.uniform(ka, (B, N, N)) > 0.5).astype(jnp.float32)
    adj = jnp.clip(a + jnp.swapaxes(a, 1, 2) + jnp.eye(N)[None], 0.0, 1.0)
    tgt = (jax.random.uniform(kt, (B,)) > 0.5).astype(jnp.float32)

    params = _init_params(kp, H)
    ref_logits, ref_loss = _reference_forward(x, adj, params, tgt)

    # f32 path — tight check against the pure-JAX reference (tolerance covers
    # the Ws|Wn reassociation's f32 rounding differences).
    fwd_f32 = jax.jit(functools.partial(text_classifier_forward,
                                        compute_dtype=jnp.float32))
    logits, loss = fwd_f32(x, adj, params, tgt)
    jax.block_until_ready((logits, loss))
    assert jnp.allclose(logits, ref_logits, atol=5e-4, rtol=5e-4)
    assert jnp.allclose(loss, ref_loss, atol=5e-4, rtol=5e-4)

    # Production bf16 path (recommended on all generations) — f32 accumulation
    # and f32 adjacency, looser tolerance for bf16 matmul inputs.
    fwd_bf16 = jax.jit(text_classifier_forward)
    logits_bf16, loss_bf16 = fwd_bf16(x, adj, params, tgt)
    jax.block_until_ready((logits_bf16, loss_bf16))
    assert jnp.allclose(logits_bf16, ref_logits, atol=5e-2, rtol=5e-2)
    assert jnp.allclose(loss_bf16, ref_loss, atol=5e-2, rtol=5e-2)

    print("KERNEL_OK")
</pallas_src>

<mosaic_0001>
module attributes {stable_mosaic.version = 11 : i64} {
  func.func @_graphsage_maxpool_kernel(%arg0: i32, %arg1: memref<64x32xf32, #tpu.memory_space<vmem>>, %arg2: memref<8x8x8xf32, #tpu.memory_space<vmem>>, %arg3: memref<32x256xf32, #tpu.memory_space<vmem>>, %arg4: memref<1x128xf32, #tpu.memory_space<vmem>>, %arg5: memref<8x128xf32, #tpu.memory_space<vmem>>) attributes {dimension_semantics = [#tpu.dimension_semantics<parallel>], iteration_bounds = array<i64: 1>, scalar_prefetch = 0 : i64, scratch_operands = 0 : i64, tpu.core_type = #tpu.core_type<tc>, window_params = [{transform_indices = @transform_0, window_bounds = array<i64: 64, 32>}, {transform_indices = @transform_1, window_bounds = array<i64: 8, 8, 8>}, {pipeline_mode = #tpu.pipeline_mode<synchronous>, transform_indices = @transform_2, window_bounds = array<i64: 32, 256>}, {pipeline_mode = #tpu.pipeline_mode<synchronous>, transform_indices = @transform_3, window_bounds = array<i64: 1, 128>}, {transform_indices = @transform_4, window_bounds = array<i64: 8, 128>}]} {
    %c0 = arith.constant 0 : index
    %c0_0 = arith.constant 0 : index
    %0 = vector.load %arg1[%c0, %c0_0] : memref<64x32xf32, #tpu.memory_space<vmem>>, vector<64x32xf32>
    %c0_1 = arith.constant 0 : index
    %c0_2 = arith.constant 0 : index
    %1 = vector.load %arg3[%c0_1, %c0_2] : memref<32x256xf32, #tpu.memory_space<vmem>>, vector<32x256xf32>
    %cst = arith.constant dense<0.000000e+00> : vector<64x256xf32>
    %2 = tpu.matmul %0, %1, %cst {dimension_numbers = #tpu.dot_dimension_numbers<[1], [0], [0], [1], [0, 0, 1, 1], [], []>} : vector<64x32xf32>, vector<32x256xf32>, vector<64x256xf32> -> vector<64x256xf32>
    %3 = vector.extract_strided_slice %2 {offsets = [0, 0], sizes = [64, 128], strides = [1, 1]} : vector<64x256xf32> to vector<64x128xf32>
    %c0_3 = arith.constant 0 : index
    %c0_4 = arith.constant 0 : index
    %4 = vector.load %arg4[%c0_3, %c0_4] : memref<1x128xf32, #tpu.memory_space<vmem>>, vector<1x128xf32>
    %5 = vector.broadcast %4 : vector<1x128xf32> to vector<64x128xf32>
    %6 = arith.addf %3, %5 : vector<64x128xf32>
    %7 = vector.extract_strided_slice %2 {offsets = [0, 128], sizes = [64, 128], strides = [1, 1]} : vector<64x256xf32> to vector<64x128xf32>
    %c0_5 = arith.constant 0 : index
    %c0_6 = arith.constant 0 : index
    %c0_7 = arith.constant 0 : index
    %8 = vector.load %arg2[%c0_5, %c0_6, %c0_7] : memref<8x8x8xf32, #tpu.memory_space<vmem>>, vector<8x8x8xf32>
    %9 = vector.shape_cast %7 : vector<64x128xf32> to vector<8x8x128xf32>
    "tpu.trace_start"() <{level = 10 : i32, message = "gnm,gmh->gnh"}> : () -> ()
    %cst_8 = arith.constant dense<0.000000e+00> : vector<8x8x128xf32>
    %10 = tpu.matmul %8, %9, %cst_8 {dimension_numbers = #tpu.dot_dimension_numbers<[2], [1], [1], [2], [0, 0, 0, 1, 1, 2], [0], [0]>} : vector<8x8x8xf32>, vector<8x8x128xf32>, vector<8x8x128xf32> -> vector<8x8x128xf32>
    "tpu.trace_stop"() : () -> ()
    %11 = vector.shape_cast %6 : vector<64x128xf32> to vector<8x8x128xf32>
    %12 = arith.addf %11, %10 : vector<8x8x128xf32>
    %cst_9 = arith.constant 0.000000e+00 : f32
    %13 = vector.broadcast %cst_9 : f32 to vector<8x8x128xf32>
    %14 = arith.maximumf %12, %13 : vector<8x8x128xf32>
    %cst_10 = arith.constant dense<0xFF800000> : vector<8x128xf32>
    %15 = vector.multi_reduction <maximumf>, %14, %cst_10 [1] : vector<8x8x128xf32> to vector<8x128xf32>
    %c0_11 = arith.constant 0 : index
    %c0_12 = arith.constant 0 : index
    %16 = vector.load %arg5[%c0_11, %c0_12] : memref<8x128xf32, #tpu.memory_space<vmem>>, vector<8x128xf32>
    tpu.vector_store %arg5[%c0_11, %c0_12], %15 {strides = array<i32>} : memref<8x128xf32, #tpu.memory_space<vmem>>, vector<8x128xf32>,
    return
  }
  func.func @transform_0(%arg0: i32) -> (i32, i32) {
    %c0_i32 = arith.constant 0 : i32
    %c0_i32_0 = arith.constant 0 : i32
    return %arg0, %c0_i32 : i32, i32
  }
  func.func @transform_1(%arg0: i32) -> (i32, i32, i32) {
    %c0_i32 = arith.constant 0 : i32
    %c0_i32_0 = arith.constant 0 : i32
    %c0_i32_1 = arith.constant 0 : i32
    return %arg0, %c0_i32, %c0_i32_0 : i32, i32, i32
  }
  func.func @transform_2(%arg0: i32) -> (i32, i32) {
    %c0_i32 = arith.constant 0 : i32
    %c0_i32_0 = arith.constant 0 : i32
    %c0_i32_1 = arith.constant 0 : i32
    return %c0_i32, %c0_i32_0 : i32, i32
  }
  func.func @transform_3(%arg0: i32) -> (i32, i32) {
    %c0_i32 = arith.constant 0 : i32
    %c0_i32_0 = arith.constant 0 : i32
    %c0_i32_1 = arith.constant 0 : i32
    return %c0_i32, %c0_i32_0 : i32, i32
  }
  func.func @transform_4(%arg0: i32) -> (i32, i32) {
    %c0_i32 = arith.constant 0 : i32
    %c0_i32_0 = arith.constant 0 : i32
    return %arg0, %c0_i32 : i32, i32
  }
}

</mosaic_0001>

<bundles_post_ra>
// kernel: text_classifier_forward.1
= control target key start
LH: loop header
LB: loop body
LE: loop exit
PB: predicated region body
PF: predicated region fallthrough
CT: control target
= control target key end

     0   :  { %vm33_vm0 = vcmask 261120   ;;  %vm160_vm1 = vcmask 64512   ;;  %vm417_vm2 = vcmask 1041409   ;;  %vm419_vm3 = vcmask 1042434   ;;  %s597_s2 = inlined_call_operand.vmem [shape: f32[32,256], index: 2, kind: input, shape index: {}]   ;;  %s598_s0 = inlined_call_operand.vmem [shape: f32[64,32], index: 0, kind: input, shape index: {}]   ;;  %s599_s3 = inlined_call_operand.vmem [shape: f32[1,128], index: 3, kind: input, shape index: {}]   ;;  %s600_s1 = inlined_call_operand.vmem [shape: f32[8,8,8], index: 1, kind: input, shape index: {}]   ;;  %s601_s4 = inlined_call_operand.vmem [shape: f32[8,128], index: 4, kind: output, shape index: {}]  }
   0x1   :  { %v32_v0 = vld [vmem:[%s597_s2 + $0x38] sm:$0xff]  ;;  %v30_v1 = vld [vmem:[%s597_s2 + $0x28] sm:$0xff]  ;;  %v17_v4 = vld [vmem:[%s598_s0] sm:$0xff]  ;;  %vm421_vm4 = vcmask 1043459   ;;  %vm423_vm5 = vcmask 1044484   ;;  %vm425_vm6 = vcmask 1045509  }
   0x2   :  { %111 = vmatpush.msra.mxu1 %v32_v0  ;;  %465 = vmatpush.msra.mxu3 %v32_v0  ;;  %v28_v2 = vld [vmem:[%s597_s2 + $0x18] sm:$0xff]  ;;  %v26_v3 = vld [vmem:[%s597_s2 + $0x8] sm:$0xff]  ;;  %v23_v5 = vld [vmem:[%s598_s0 + $0x30] sm:$0xff]  ;;  %vm427_vm7 = vcmask 1046534   ;;  %vm429_vm8 = vcmask 1047559  }
   0x3   :  { %v18_v6 = vld [vmem:[%s598_s0 + $0x8] sm:$0xff]  ;;  %v24_v7 = vld [vmem:[%s598_s0 + $0x38] sm:$0xff]  ;;  %v31_v8 = vld [vmem:[%s597_s2 + $0x30] sm:$0xff] }
   0x4   :  { %112 = vmatpush.msra.mxu1 %v30_v1  ;;  %466 = vmatpush.msra.mxu3 %v30_v1  ;;  %v29_v9 = vld [vmem:[%s597_s2 + $0x20] sm:$0xff]  ;;  %v27_v10 = vld [vmem:[%s597_s2 + $0x10] sm:$0xff]  ;;  %v20_v13 = vld [vmem:[%s598_s0 + $0x18] sm:$0xff] }
   0x5   :  { %461 = vmatpush.msra.mxu2 %v31_v8  ;;  %70 = vmatpush.msra.mxu0 %v31_v8  ;;  %v25_v11 = vld [vmem:[%s597_s2] sm:$0xff]  ;;  %v19_v12 = vld [vmem:[%s598_s0 + $0x10] sm:$0xff]  ;;  %v22_v15 = vld [vmem:[%s598_s0 + $0x28] sm:$0xff] }
   0x6   :  { %113 = vmatpush.msra.mxu1 %v28_v2  ;;  %467 = vmatpush.msra.mxu3 %v28_v2  ;;  %v21_v14 = vld [vmem:[%s598_s0 + $0x20] sm:$0xff]  ;;  %v153_v18 = vld [vmem:[%s600_s1 + $0x8] sm:$0xff]  ;;  %v154_v20 = vld [vmem:[%s600_s1 + $0x10] sm:$0xff] }
   0x7   :  { %462 = vmatpush.msra.mxu2 %v29_v9  ;;  %71 = vmatpush.msra.mxu0 %v29_v9  ;;  %v152_v16 = vld [vmem:[%s600_s1] sm:$0xff]  ;;  %v155_v22 = vld [vmem:[%s600_s1 + $0x18] sm:$0xff]  ;;  %v157_v27 = vld [vmem:[%s600_s1 + $0x28] sm:$0xff] }
   0x8   :  { %114 = vmatpush.msra.mxu1 %v26_v3  ;;  %468 = vmatpush.msra.mxu3 %v26_v3  ;;  %v156_v25 = vld [vmem:[%s600_s1 + $0x20] sm:$0xff]  ;;  %v158_v28 = vld [vmem:[%s600_s1 + $0x30] sm:$0xff]  ;;  %v159_v31 = vld [vmem:[%s600_s1 + $0x38] sm:$0xff] }
   0x9   :  { %445 = vmatmul.msk.f32.vlgmr.msra.gmra.mxu1 %vm33_vm0, %v17_v4  ;;  %451 = vmatmul.msk.f32.vlgmr.msra.gmra.mxu3 %vm33_vm0, %v23_v5  ;;  %v469_v40 = vld [vmem:[%s599_s3] ss:$0 sm:$0xff] }
   0xa   :  { %463 = vmatpush.msra.mxu2 %v27_v10  ;;  %72 = vmatpush.msra.mxu0 %v27_v10 }
   0xc   :  { %464 = vmatpush.msra.mxu2 %v25_v11  ;;  %73 = vmatpush.msra.mxu0 %v25_v11 }
   0xd   :  { %443 = vmatmul.msk.f32.vlgmr.msra.gmra.mxu2 %vm33_vm0, %v23_v5  ;;  %437 = vmatmul.msk.f32.vlgmr.msra.gmra.mxu0 %vm33_vm0, %v17_v4 }
  0x11   :  { %446 = vmatmul.msk.f32.gmra.mxu1 %vm33_vm0, %v18_v6  ;;  %452 = vmatmul.msk.f32.gmra.mxu3 %vm33_vm0, %v24_v7 }
  0x15   :  { %444 = vmatmul.msk.f32.gmra.mxu2 %vm33_vm0, %v24_v7  ;;  %438 = vmatmul.msk.f32.gmra.mxu0 %vm33_vm0, %v18_v6 }
  0x19   :  { %447 = vmatmul.msk.f32.gmra.mxu1 %vm33_vm0, %v19_v12 }
  0x1d   :  { %439 = vmatmul.msk.f32.gmra.mxu0 %vm33_vm0, %v19_v12 }
  0x21   :  { %448 = vmatmul.msk.f32.gmra.mxu1 %vm33_vm0, %v20_v13 }
  0x25   :  { %440 = vmatmul.msk.f32.gmra.mxu0 %vm33_vm0, %v20_v13 }
  0x29   :  { %449 = vmatmul.msk.f32.gmra.mxu1 %vm33_vm0, %v21_v14 }
  0x2d   :  { %441 = vmatmul.msk.f32.gmra.mxu0 %vm33_vm0, %v21_v14 }
  0x31   :  { %450 = vmatmul.msk.f32.gmra.mxu1 %vm33_vm0, %v22_v15 }
  0x35   :  { %442 = vmatmul.msk.f32.gmra.mxu0 %vm33_vm0, %v22_v15 }
  0x86   :  { %v116_v17 = vpop.f32.mrf.mxu1 }
  0x87   :  { %179 = vmatpush.msrb.mxu2 %v116_v17 }
  0x88   :  { %453 = vmatmul.msk.f32.vlgmr.msrb.gmra.mxu2 %vm160_vm1, %v152_v16 }
  0x8a   :  { %v75_v32 = vpop.f32.mrf.mxu0 }
  0x8b   :  { %v144_v43 = vadd.f32 %v469_v40, %v75_v32 }
  0x8c   :  { %v134_v24 = vpop.f32.mrf.mxu3 }
  0x8e   :  { %v119_v19 = vpop.f32.mrf.mxu1 }
  0x8f   :  { %202 = vmatpush.msrb.mxu3 %v119_v19 }
  0x90   :  { %454 = vmatmul.msk.f32.vlgmr.msrb.gmra.mxu3 %vm160_vm1, %v153_v18  ;;  %v93_v34 = vpop.f32.mrf.mxu2 }
  0x91   :  { %v150_v5 = vadd.f32 %v469_v40, %v93_v34 }
  0x92   :  { %v78_v33 = vpop.f32.mrf.mxu0 }
  0x93   :  { %v145_v41 = vadd.f32 %v469_v40, %v78_v33 }
  0x94   :  { %v137_v30 = vpop.f32.mrf.mxu3 }
  0x96   :  { %v122_v21 = vpop.f32.mrf.mxu1 }
  0x97   :  { %225 = vmatpush.msra.mxu2 %v122_v21 }
  0x98   :  { %455 = vmatmul.msk.f32.vlgmr.msra.gmra.mxu2 %vm160_vm1, %v154_v20  ;;  %v96_v36 = vpop.f32.mrf.mxu2 }
  0x9a   :  { %v81_v35 = vpop.f32.mrf.mxu0 }
  0x9b   :  { %v146_v42 = vadd.f32 %v469_v40, %v81_v35 }
  0x9e   :  { %v125_v23 = vpop.f32.mrf.mxu1 }
  0x9f   :  { %248 = vmatpush.msra.mxu3 %v125_v23  ;;  %v151_v23 = vadd.f32 %v469_v40, %v96_v36 }
  0xa0   :  { %456 = vmatmul.msk.f32.vlgmr.msra.gmra.mxu3 %vm160_vm1, %v155_v22 }
  0xa2   :  { %v84_v37 = vpop.f32.mrf.mxu0 }
  0xa3   :  { %v147_v45 = vadd.f32 %v469_v40, %v84_v37 }
  0xa6   :  { %v128_v26 = vpop.f32.mrf.mxu1 }
  0xa7   :  { %271 = vmatpush.msrb.mxu2 %v128_v26 }
  0xa8   :  { %457 = vmatmul.msk.f32.vlgmr.msrb.gmra.mxu2 %vm160_vm1, %v156_v25 }
  0xa9   :  { %317 = vmatpush.msra.mxu2 %v134_v24 }
  0xaa   :  { %v87_v47 = vpop.f32.mrf.mxu0 }
  0xab   :  { %v148_v53 = vadd.f32 %v469_v40, %v87_v47 }
  0xae   :  { %v131_v29 = vpop.f32.mrf.mxu1 }
  0xaf   :  { %294 = vmatpush.msrb.mxu3 %v131_v29 }
  0xb0   :  { %458 = vmatmul.msk.f32.vlgmr.msrb.gmra.mxu3 %vm160_vm1, %v157_v27  ;;  %459 = vmatmul.msk.f32.vlgmr.msra.gmra.mxu2 %vm160_vm1, %v158_v28 }
  0xb1   :  { %340 = vmatpush.msra.mxu3 %v137_v30 }
  0xb2   :  { %v90_v61 = vpop.f32.mrf.mxu0 }
  0xb3   :  { %v149_v3 = vadd.f32 %v469_v40, %v90_v61 }
  0xb8   :  { %460 = vmatmul.msk.f32.vlgmr.msra.gmra.mxu3 %vm160_vm1, %v159_v31 }
 0x10b   :  { %v181_v38 = vpop.f32.mrf.mxu2 }
 0x10c   :  { %v345_v50 = vadd.f32 %v181_v38, %v144_v43 }
 0x10e   :  { %v353_v55 = vmax.f32 %v345_v50, 0.0 }
 0x110   :  { %v361_v62 = vrot.slane %v353_v55, 4 }
 0x112   :  { %v362_v6 = vmax.f32 %v353_v55, %v361_v62 }
 0x113   :  { %v204_v39 = vpop.f32.mrf.mxu3 }
 0x114   :  { %v346_v48 = vadd.f32 %v204_v39, %v145_v41  ;;  %v363_v15 = vrot.slane %v362_v6, 2 }
 0x116   :  { %v354_v52 = vmax.f32 %v346_v48, 0.0  ;;  %v364_v25 = vmax.f32 %v362_v6, %v363_v15 }
 0x118   :  { %v367_v58 = vrot.slane %v354_v52, 4  ;;  %v365_v37 = vrot.slane %v364_v25, 1 }
 0x11a   :  { %v368_v1 = vmax.f32 %v354_v52, %v367_v58 }
 0x11b   :  { %v227_v44 = vpop.f32.mrf.mxu2 }
 0x11c   :  { %v347_v49 = vadd.f32 %v227_v44, %v146_v42  ;;  %v369_v11 = vrot.slane %v368_v1, 2 }
 0x11e   :  { %v355_v54 = vmax.f32 %v347_v49, 0.0  ;;  %v370_v20 = vmax.f32 %v368_v1, %v369_v11 }
 0x120   :  { %v373_v60 = vrot.slane %v355_v54, 4  ;;  %v371_v31 = vrot.slane %v370_v20, 1 }
 0x122   :  { %v374_v4 = vmax.f32 %v355_v54, %v373_v60  ;;  %v372_v44 = vmax.f32 %v370_v20, %v371_v31 }
 0x123   :  { %v250_v46 = vpop.f32.mrf.mxu3 }
 0x124   :  { %v348_v51 = vadd.f32 %v250_v46, %v147_v45  ;;  %v375_v14 = vrot.slane %v374_v4, 2  ;;  %v366_v46 = vmax.f32 %v364_v25, %v365_v37 }
 0x126   :  { %v356_v56 = vmax.f32 %v348_v51, 0.0  ;;  %v376_v24 = vmax.f32 %v374_v4, %v375_v14  ;;  %v418_v51 = vsel %vm417_vm2, %v372_v44, %v366_v46 }
 0x128   :  { %v379_v63 = vrot.slane %v356_v56, 4  ;;  %v377_v35 = vrot.slane %v376_v24, 1 }
 0x12a   :  { %v380_v7 = vmax.f32 %v356_v56, %v379_v63  ;;  %v378_v45 = vmax.f32 %v376_v24, %v377_v35 }
 0x12b   :  { %v273_v57 = vpop.f32.mrf.mxu2 }
 0x12c   :  { %v349_v59 = vadd.f32 %v273_v57, %v148_v53  ;;  %v381_v16 = vrot.slane %v380_v7, 2  ;;  %v420_v54 = vsel %vm419_vm3, %v378_v45, %v418_v51 }
 0x12e   :  { %v357_v0 = vmax.f32 %v349_v59, 0.0  ;;  %v382_v26 = vmax.f32 %v380_v7, %v381_v16 }
 0x130   :  { %v385_v2 = vrot.slane %v357_v0, 4  ;;  %v383_v38 = vrot.slane %v382_v26, 1 }
 0x132   :  { %v386_v8 = vmax.f32 %v357_v0, %v385_v2  ;;  %v384_v47 = vmax.f32 %v382_v26, %v383_v38 }
 0x133   :  { %v296_v9 = vpop.f32.mrf.mxu3  ;;  %v319_v10 = vpop.f32.mrf.mxu2 }
 0x134   :  { %v350_v12 = vadd.f32 %v296_v9, %v149_v3  ;;  %v351_v13 = vadd.f32 %v319_v10, %v150_v5  ;;  %v387_v19 = vrot.slane %v386_v8, 2  ;;  %v422_v55 = vsel %vm421_vm4, %v384_v47, %v420_v54 }
 0x136   :  { %v358_v17 = vmax.f32 %v350_v12, 0.0  ;;  %v359_v18 = vmax.f32 %v351_v13, 0.0  ;;  %v388_v29 = vmax.f32 %v386_v8, %v387_v19 }
 0x138   :  { %v391_v21 = vrot.slane %v358_v17, 4  ;;  %v397_v22 = vrot.slane %v359_v18, 4  ;;  %v389_v42 = vrot.slane %v388_v29, 1 }
 0x13a   :  { %v392_v27 = vmax.f32 %v358_v17, %v391_v21  ;;  %v398_v28 = vmax.f32 %v359_v18, %v397_v22  ;;  %v390_v49 = vmax.f32 %v388_v29, %v389_v42 }
 0x13b   :  { %v342_v30 = vpop.f32.mrf.mxu3 }
 0x13c   :  { %v393_v32 = vrot.slane %v392_v27, 2  ;;  %v399_v33 = vrot.slane %v398_v28, 2  ;;  %v352_v34 = vadd.f32 %v342_v30, %v151_v23  ;;  %v424_v57 = vsel %vm423_vm5, %v390_v49, %v422_v55 }
 0x13e   :  { %v394_v39 = vmax.f32 %v392_v27, %v393_v32  ;;  %v360_v41 = vmax.f32 %v352_v34, 0.0  ;;  %v400_v43 = vmax.f32 %v398_v28, %v399_v33 }
 0x140   :  { %v395_v36 = vrot.slane %v394_v39, 1  ;;  %v403_v40 = vrot.slane %v360_v41, 4  ;;  %v401_v50 = vrot.slane %v400_v43, 1 }
 0x142   :  { %v404_v48 = vmax.f32 %v360_v41, %v403_v40  ;;  %v396_v52 = vmax.f32 %v394_v39, %v395_v36  ;;  %v402_v58 = vmax.f32 %v400_v43, %v401_v50 }
 0x144   :  { %v405_v53 = vrot.slane %v404_v48, 2  ;;  %v426_v59 = vsel %vm425_vm6, %v396_v52, %v424_v57 }
 0x145   :  { %v428_v62 = vsel %vm427_vm7, %v402_v58, %v426_v59 }
 0x146   :  { %v406_v56 = vmax.f32 %v404_v48, %v405_v53 }
 0x148   :  { %v407_v60 = vrot.slane %v406_v56, 1 }
 0x14a   :  { %v408_v61 = vmax.f32 %v406_v56, %v407_v60 }
 0x14c   :  { %v430_v63 = vsel %vm429_vm8, %v408_v61, %v428_v62 }
 0x14d   :  { %432 = vst [vmem:[%s601_s4] sm:$0xff] %v430_v63 }

</bundles_post_ra>
